<compile_context>
chip_gen: v6e
topology: v6e:2x2x1
jax: 0.10.0
libtpu: 0.0.40
codegen_flags: <defaults>
</compile_context>

<pallas_src>
import functools
import numpy as np
import jax
import jax.numpy as jnp
from jax.experimental import pallas as pl
from jax.experimental.pallas import tpu as pltpu


def _round_up(x, m):
    return (x + m - 1) // m * m


def upconv_fused_kernel(x_ref, w_ref, o_ref, rhs_ref, *, pitch, hpp, cin8):
    # x_ref  : (1, Cin8, NPIX)   bias/zero-augmented, zero-padded, flattened input
    # w_ref  : (Co8, 9*Cin8)     composite 2x2-conv weights, all 9 taps stacked along K
    # o_ref  : (1, Co8, HPP)     phase-major output, lane-dense (HPP % 128 == 0)
    # rhs_ref: (9*Cin8, HPP)     VMEM scratch holding the 9 shifted input views
    for t in range(9):                              # static offsets, 8-aligned sublanes
        r, c = t // 3, t % 3
        s = r * pitch + c                           # static lane offset of tap (r, c)
        rhs_ref[t * cin8:(t + 1) * cin8, :] = x_ref[0, :, s:s + hpp]
    # One big MXU matmul; conv bias already folded into w -> just ReLU and store.
    acc = jnp.dot(w_ref[...], rhs_ref[...], preferred_element_type=jnp.float32)
    o_ref[0] = jnp.maximum(acc, 0.0).astype(o_ref.dtype)


def upconv_block(x_nchw, w_up, b_up, w_conv, b_conv):
    """Fused ConvTranspose2d(k=2,s=2) -> Conv2d(k=3,p=1) -> ReLU.  NCHW in / NCHW out."""
    N, Cin, H, W = x_nchw.shape
    Cout = w_conv.shape[0]
    Cout4 = 4 * Cout
    cin8 = _round_up(Cin + 1, 8)                    # x channels + ones channel, 8-aligned
    co8 = _round_up(Cout4, 8)                       # phase-major output channels, 8-aligned
    pitch = W + 2                                   # row pitch of the padded image
    hpp = _round_up(H * pitch, 128)                 # lane-dense output extent
    npix = _round_up(2 * pitch + 2 + hpp, 128)      # covers every tap window end
    hi = jax.lax.Precision.HIGHEST

    # ---- composite 2x2-conv weights (fold ConvTranspose + 3x3 conv + both biases) ----
    # Output phase (pa,pb), conv tap (dp,dq) reads upsampled pixel built from
    #   x[a+da, b+db] @ w_up[:,:,ki,kj] + b_up   with t = pa-1+dp, da = t//2, ki = t%2
    # (same for columns).  Group every contribution by its x offset (r,c) = (da+1, db+1).
    wbig = jnp.zeros((3, 3, cin8, co8), jnp.float32)
    for pa in range(2):
        for dp in range(3):
            t = pa - 1 + dp
            da, ki = t // 2, t % 2
            for pb in range(2):
                for dq in range(3):
                    u = pb - 1 + dq
                    db, kj = u // 2, u % 2
                    p = 2 * pa + pb
                    wc_m = w_conv[:, :, dp, dq].T                         # (Cin, Cout)
                    comp = jnp.dot(w_up[:, :, ki, kj], wc_m, precision=hi)
                    brow = jnp.dot(b_up[None, :], wc_m, precision=hi)     # (1, Cout)
                    wbig = wbig.at[da + 1, db + 1, :Cin,
                                   p * Cout:(p + 1) * Cout].add(comp)
                    wbig = wbig.at[da + 1, db + 1, Cin,
                                   p * Cout:(p + 1) * Cout].add(brow[0])
    # Conv2d bias: ones channel at the centre tap is 1 for every kept output pixel.
    wbig = wbig.at[1, 1, Cin, :Cout4].add(jnp.tile(b_conv, 4))
    # (Co8, 9*Cin8) with K ordered as (tap t = 3r+c, channel)
    w_k = jnp.transpose(wbig.reshape(9, cin8, co8), (2, 0, 1)).reshape(co8, 9 * cin8)

    # ---- input re-layout: channels-first, ones + zero channels, pad, flatten ----------
    ones = jnp.ones((N, 1, H, W), x_nchw.dtype)
    zpad = jnp.zeros((N, cin8 - Cin - 1, H, W), x_nchw.dtype)
    xa = jnp.concatenate([x_nchw, ones, zpad], axis=1)                    # (N,Cin8,H,W)
    xa = jnp.pad(xa, ((0, 0), (0, 0), (1, 1), (1, 1)))                    # (N,Cin8,H+2,W+2)
    xa = xa.reshape(N, cin8, (H + 2) * pitch)
    xa = jnp.pad(xa, ((0, 0), (0, 0), (0, npix - (H + 2) * pitch)))       # (N,Cin8,NPIX)

    kernel = functools.partial(upconv_fused_kernel, pitch=pitch, hpp=hpp, cin8=cin8)
    phases = pl.pallas_call(
        kernel,
        out_shape=jax.ShapeDtypeStruct((N, co8, hpp), jnp.float32),
        grid_spec=pltpu.PrefetchScalarGridSpec(
            num_scalar_prefetch=0,
            grid=(N,),
            in_specs=[
                pl.BlockSpec((1, cin8, npix), lambda n: (n, 0, 0)),
                pl.BlockSpec((co8, 9 * cin8), lambda n: (0, 0)),
            ],
            out_specs=pl.BlockSpec((1, co8, hpp), lambda n: (n, 0, 0)),
            scratch_shapes=[pltpu.VMEM((9 * cin8, hpp), jnp.float32)],
        ),
        # batch elements are independent -> shard across TensorCores on v7x
        compiler_params=pltpu.CompilerParams(dimension_semantics=("parallel",)),
    )(xa, w_k)

    # ---- phase interleave back to NCHW:
    #   out[n, d, 2a+pa, 2b+pb] = phases[n, (2*pa+pb)*Cout + d, a*pitch + b]
    o = phases[:, :Cout4, :H * pitch].reshape(N, 2, 2, Cout, H, pitch)[..., :W]
    o = jnp.transpose(o, (0, 3, 4, 1, 5, 2))        # (N, Cout, H, 2, W, 2)
    return o.reshape(N, Cout, 2 * H, 2 * W)


def reference_upconv(x, w_up, b_up, w_conv, b_conv):
    """Pure-JAX reference matching PyTorch semantics (NCHW)."""
    N, Cin, H, W = x.shape
    Cout = w_conv.shape[0]
    u = jnp.zeros((N, Cin, 2 * H, 2 * W), x.dtype)
    for ki in range(2):
        for kj in range(2):
            contrib = jnp.einsum('nchw,cd->ndhw', x, w_up[:, :, ki, kj])
            u = u.at[:, :, ki::2, kj::2].set(contrib)
    u = u + b_up[None, :, None, None]
    up = jnp.pad(u, ((0, 0), (0, 0), (1, 1), (1, 1)))
    o = jnp.zeros((N, Cout, 2 * H, 2 * W), x.dtype)
    for dp in range(3):
        for dq in range(3):
            o = o + jnp.einsum('nchw,dc->ndhw',
                               up[:, :, dp:dp + 2 * H, dq:dq + 2 * W],
                               w_conv[:, :, dp, dq])
    o = o + b_conv[None, :, None, None]
    return jnp.maximum(o, 0.0)


if __name__ == "__main__":
    key = jax.random.PRNGKey(0)
    k1, k2, k3, k4, k5 = jax.random.split(key, 5)

    N, Cin, Cout, H, W = 2, 4, 8, 16, 16
    x = jax.random.normal(k1, (N, Cin, H, W), jnp.float32)
    w_up = jax.random.normal(k2, (Cin, Cin, 2, 2), jnp.float32) * 0.3     # ConvTranspose2d weight
    b_up = jax.random.normal(k3, (Cin,), jnp.float32) * 0.1
    w_conv = jax.random.normal(k4, (Cout, Cin, 3, 3), jnp.float32) * 0.2  # Conv2d weight
    b_conv = jax.random.normal(k5, (Cout,), jnp.float32) * 0.1

    out = jax.block_until_ready(upconv_block(x, w_up, b_up, w_conv, b_conv))
    ref = jax.block_until_ready(reference_upconv(x, w_up, b_up, w_conv, b_conv))

    assert out.shape == (N, Cout, 2 * H, 2 * W)
    # fusion reorders the FLOPs (x @ (Wup @ Wc) vs (x @ Wup) @ Wc) -> tiny f32 differences
    np.testing.assert_allclose(np.asarray(out), np.asarray(ref), rtol=1e-3, atol=1e-3)
    print("KERNEL_OK")
</pallas_src>

<mosaic_0001>
module attributes {stable_mosaic.version = 11 : i64} {
  func.func @upconv_fused_kernel(%arg0: i32, %arg1: memref<1x8x512xf32, #tpu.memory_space<vmem>>, %arg2: memref<32x72xf32, #tpu.memory_space<vmem>>, %arg3: memref<1x32x384xf32, #tpu.memory_space<vmem>>, %arg4: memref<72x384xf32, #tpu.memory_space<vmem>>) attributes {dimension_semantics = [#tpu.dimension_semantics<parallel>], iteration_bounds = array<i64: 2>, scalar_prefetch = 0 : i64, scratch_operands = 1 : i64, tpu.core_type = #tpu.core_type<tc>, window_params = [{transform_indices = @transform_0, window_bounds = array<i64: 1, 8, 512>}, {pipeline_mode = #tpu.pipeline_mode<synchronous>, transform_indices = @transform_1, window_bounds = array<i64: 32, 72>}, {transform_indices = @transform_2, window_bounds = array<i64: 1, 32, 384>}]} {
    %c0 = arith.constant 0 : index
    %c0_0 = arith.constant 0 : index
    %c0_1 = arith.constant 0 : index
    %0 = vector.load %arg1[%c0, %c0_0, %c0_1] : memref<1x8x512xf32, #tpu.memory_space<vmem>>, vector<1x8x384xf32>
    %1 = vector.shape_cast %0 : vector<1x8x384xf32> to vector<8x384xf32>
    %c0_2 = arith.constant 0 : index
    %c0_3 = arith.constant 0 : index
    %2 = vector.load %arg4[%c0_2, %c0_3] : memref<72x384xf32, #tpu.memory_space<vmem>>, vector<8x384xf32>
    tpu.vector_store %arg4[%c0_2, %c0_3], %1 {strides = array<i32>} : memref<72x384xf32, #tpu.memory_space<vmem>>, vector<8x384xf32>,
    %c0_4 = arith.constant 0 : index
    %c0_5 = arith.constant 0 : index
    %c1 = arith.constant 1 : index
    %3 = vector.load %arg1[%c0_4, %c0_5, %c1] : memref<1x8x512xf32, #tpu.memory_space<vmem>>, vector<1x8x384xf32>
    %4 = vector.shape_cast %3 : vector<1x8x384xf32> to vector<8x384xf32>
    %c8 = arith.constant 8 : index
    %c0_6 = arith.constant 0 : index
    %5 = vector.load %arg4[%c8, %c0_6] : memref<72x384xf32, #tpu.memory_space<vmem>>, vector<8x384xf32>
    tpu.vector_store %arg4[%c8, %c0_6], %4 {strides = array<i32>} : memref<72x384xf32, #tpu.memory_space<vmem>>, vector<8x384xf32>,
    %c0_7 = arith.constant 0 : index
    %c0_8 = arith.constant 0 : index
    %c2 = arith.constant 2 : index
    %6 = vector.load %arg1[%c0_7, %c0_8, %c2] : memref<1x8x512xf32, #tpu.memory_space<vmem>>, vector<1x8x384xf32>
    %7 = vector.shape_cast %6 : vector<1x8x384xf32> to vector<8x384xf32>
    %c16 = arith.constant 16 : index
    %c0_9 = arith.constant 0 : index
    %8 = vector.load %arg4[%c16, %c0_9] : memref<72x384xf32, #tpu.memory_space<vmem>>, vector<8x384xf32>
    tpu.vector_store %arg4[%c16, %c0_9], %7 {strides = array<i32>} : memref<72x384xf32, #tpu.memory_space<vmem>>, vector<8x384xf32>,
    %c0_10 = arith.constant 0 : index
    %c0_11 = arith.constant 0 : index
    %c18 = arith.constant 18 : index
    %9 = vector.load %arg1[%c0_10, %c0_11, %c18] : memref<1x8x512xf32, #tpu.memory_space<vmem>>, vector<1x8x384xf32>
    %10 = vector.shape_cast %9 : vector<1x8x384xf32> to vector<8x384xf32>
    %c24 = arith.constant 24 : index
    %c0_12 = arith.constant 0 : index
    %11 = vector.load %arg4[%c24, %c0_12] : memref<72x384xf32, #tpu.memory_space<vmem>>, vector<8x384xf32>
    tpu.vector_store %arg4[%c24, %c0_12], %10 {strides = array<i32>} : memref<72x384xf32, #tpu.memory_space<vmem>>, vector<8x384xf32>,
    %c0_13 = arith.constant 0 : index
    %c0_14 = arith.constant 0 : index
    %c19 = arith.constant 19 : index
    %12 = vector.load %arg1[%c0_13, %c0_14, %c19] : memref<1x8x512xf32, #tpu.memory_space<vmem>>, vector<1x8x384xf32>
    %13 = vector.shape_cast %12 : vector<1x8x384xf32> to vector<8x384xf32>
    %c32 = arith.constant 32 : index
    %c0_15 = arith.constant 0 : index
    %14 = vector.load %arg4[%c32, %c0_15] : memref<72x384xf32, #tpu.memory_space<vmem>>, vector<8x384xf32>
    tpu.vector_store %arg4[%c32, %c0_15], %13 {strides = array<i32>} : memref<72x384xf32, #tpu.memory_space<vmem>>, vector<8x384xf32>,
    %c0_16 = arith.constant 0 : index
    %c0_17 = arith.constant 0 : index
    %c20 = arith.constant 20 : index
    %15 = vector.load %arg1[%c0_16, %c0_17, %c20] : memref<1x8x512xf32, #tpu.memory_space<vmem>>, vector<1x8x384xf32>
    %16 = vector.shape_cast %15 : vector<1x8x384xf32> to vector<8x384xf32>
    %c40 = arith.constant 40 : index
    %c0_18 = arith.constant 0 : index
    %17 = vector.load %arg4[%c40, %c0_18] : memref<72x384xf32, #tpu.memory_space<vmem>>, vector<8x384xf32>
    tpu.vector_store %arg4[%c40, %c0_18], %16 {strides = array<i32>} : memref<72x384xf32, #tpu.memory_space<vmem>>, vector<8x384xf32>,
    %c0_19 = arith.constant 0 : index
    %c0_20 = arith.constant 0 : index
    %c36 = arith.constant 36 : index
    %18 = vector.load %arg1[%c0_19, %c0_20, %c36] : memref<1x8x512xf32, #tpu.memory_space<vmem>>, vector<1x8x384xf32>
    %19 = vector.shape_cast %18 : vector<1x8x384xf32> to vector<8x384xf32>
    %c48 = arith.constant 48 : index
    %c0_21 = arith.constant 0 : index
    %20 = vector.load %arg4[%c48, %c0_21] : memref<72x384xf32, #tpu.memory_space<vmem>>, vector<8x384xf32>
    tpu.vector_store %arg4[%c48, %c0_21], %19 {strides = array<i32>} : memref<72x384xf32, #tpu.memory_space<vmem>>, vector<8x384xf32>,
    %c0_22 = arith.constant 0 : index
    %c0_23 = arith.constant 0 : index
    %c37 = arith.constant 37 : index
    %21 = vector.load %arg1[%c0_22, %c0_23, %c37] : memref<1x8x512xf32, #tpu.memory_space<vmem>>, vector<1x8x384xf32>
    %22 = vector.shape_cast %21 : vector<1x8x384xf32> to vector<8x384xf32>
    %c56 = arith.constant 56 : index
    %c0_24 = arith.constant 0 : index
    %23 = vector.load %arg4[%c56, %c0_24] : memref<72x384xf32, #tpu.memory_space<vmem>>, vector<8x384xf32>
    tpu.vector_store %arg4[%c56, %c0_24], %22 {strides = array<i32>} : memref<72x384xf32, #tpu.memory_space<vmem>>, vector<8x384xf32>,
    %c0_25 = arith.constant 0 : index
    %c0_26 = arith.constant 0 : index
    %c38 = arith.constant 38 : index
    %24 = vector.load %arg1[%c0_25, %c0_26, %c38] : memref<1x8x512xf32, #tpu.memory_space<vmem>>, vector<1x8x384xf32>
    %25 = vector.shape_cast %24 : vector<1x8x384xf32> to vector<8x384xf32>
    %c64 = arith.constant 64 : index
    %c0_27 = arith.constant 0 : index
    %26 = vector.load %arg4[%c64, %c0_27] : memref<72x384xf32, #tpu.memory_space<vmem>>, vector<8x384xf32>
    tpu.vector_store %arg4[%c64, %c0_27], %25 {strides = array<i32>} : memref<72x384xf32, #tpu.memory_space<vmem>>, vector<8x384xf32>,
    %c0_28 = arith.constant 0 : index
    %c0_29 = arith.constant 0 : index
    %27 = vector.load %arg2[%c0_28, %c0_29] : memref<32x72xf32, #tpu.memory_space<vmem>>, vector<32x72xf32>
    %c0_30 = arith.constant 0 : index
    %c0_31 = arith.constant 0 : index
    %28 = vector.load %arg4[%c0_30, %c0_31] : memref<72x384xf32, #tpu.memory_space<vmem>>, vector<72x384xf32>
    %cst = arith.constant dense<0.000000e+00> : vector<32x384xf32>
    %29 = tpu.matmul %27, %28, %cst {dimension_numbers = #tpu.dot_dimension_numbers<[1], [0], [0], [1], [0, 0, 1, 1], [], []>} : vector<32x72xf32>, vector<72x384xf32>, vector<32x384xf32> -> vector<32x384xf32>
    %cst_32 = arith.constant 0.000000e+00 : f32
    %30 = vector.broadcast %cst_32 : f32 to vector<32x384xf32>
    %31 = arith.maximumf %29, %30 : vector<32x384xf32>
    %c0_33 = arith.constant 0 : index
    %c0_34 = arith.constant 0 : index
    %c0_35 = arith.constant 0 : index
    %32 = vector.load %arg3[%c0_33, %c0_34, %c0_35] : memref<1x32x384xf32, #tpu.memory_space<vmem>>, vector<1x32x384xf32>
    %33 = vector.shape_cast %32 : vector<1x32x384xf32> to vector<32x384xf32>
    %34 = vector.shape_cast %31 : vector<32x384xf32> to vector<1x32x384xf32>
    tpu.vector_store %arg3[%c0_33, %c0_34, %c0_35], %34 {strides = array<i32>} : memref<1x32x384xf32, #tpu.memory_space<vmem>>, vector<1x32x384xf32>,
    return
  }
  func.func @transform_0(%arg0: i32) -> (i32, i32, i32) {
    %c0_i32 = arith.constant 0 : i32
    %c0_i32_0 = arith.constant 0 : i32
    %c0_i32_1 = arith.constant 0 : i32
    return %arg0, %c0_i32, %c0_i32_0 : i32, i32, i32
  }
  func.func @transform_1(%arg0: i32) -> (i32, i32) {
    %c0_i32 = arith.constant 0 : i32
    %c0_i32_0 = arith.constant 0 : i32
    %c0_i32_1 = arith.constant 0 : i32
    return %c0_i32, %c0_i32_0 : i32, i32
  }
  func.func @transform_2(%arg0: i32) -> (i32, i32, i32) {
    %c0_i32 = arith.constant 0 : i32
    %c0_i32_0 = arith.constant 0 : i32
    %c0_i32_1 = arith.constant 0 : i32
    return %arg0, %c0_i32, %c0_i32_0 : i32, i32, i32
  }
}

</mosaic_0001>

<bundles_post_ra>
// kernel: tpu_custom_call.1
= control target key start
LH: loop header
LB: loop body
LE: loop exit
PB: predicated region body
PF: predicated region fallthrough
CT: control target
= control target key end

     0   :  { %7 = vsyncpa [#allocation4], 0  ;;  %s1272_s0 = inlined_call_operand.hbm [shape: f32[2,8,512], index: 0, kind: input, shape index: {}]   ;;  %s1273_s1 = inlined_call_operand.hbm [shape: f32[32,72], index: 1, kind: input, shape index: {}]   ;;  %s1274_s2 = inlined_call_operand.hbm [shape: f32[2,32,384], index: 2, kind: output, shape index: {}]  }
   0x1   :  { %9 = vsyncpa [#allocation4 + $0x1], 0 }
   0x2   :  { %10 = vsyncpa [#allocation7], 0 }
   0x3   :  { %11 = vsyncpa [#allocation5], 0 }
   0x4   :  { %13 = vsyncpa [#allocation5 + $0x1], 0  ;;  %s1014_s9 = smov 0   ;;  %s1016_s10 = smov 0  }
   0x5   :  { %s1018_s11 = smov 0   ;;  %s1020_s12 = smov 0  }
   0x6 LB: > { %s1035_s13 = sadd.s32 4294967295, %s981_s12   ;;  %s728_s14 = sadd.s32 4294967294, %s981_s12   ;;  %s981_s12 = sphi %s1020_s12, %s1296_s12   ;;  %s977_s11 = sphi %s1018_s11, %s1295_s11   ;;  %s973_s10 = sphi %s1016_s10, %s1294_s10   ;;  %s969_s9 = sphi %s1014_s9, %s1293_s9  }
   0x7   : > { %p39_p0 = scmp.ne.s32.totalorder %s973_s10, %s969_s9  ;;  %p1275_p1 = scmp.eq.s32.totalorder %s1035_s13, 0 }
   0x8   : > { %p90_p3 = scmp.eq.s32.totalorder %s728_s14, 1  ;;  %p729_p5 = scmp.ge.s32.totalorder %s981_s12, 1 }
   0x9   : > { %p1044_p4 = por %p1275_p1, %p39_p0  ;;  %p97_p7 = scmp.lt.s32.totalorder %s981_s12, 3 }
   0xa   : > { %p1049_p6 = por %p90_p3, %p39_p0  ;;  %s983_s18 = smov [#allocation6]  }
   0xb   : > { %s1279_s15 = scalar_select %p1044_p4, 1, 0 }
   0xc   : > { %s1280_s16 = scalar_select %p1049_p6, 1, 0 }
   0xd   : > { %p1054_p8 = pnand %p729_p5, %p97_p7  ;;  %s109_s19 = sshll.u32 %s983_s18, 4  ;;  %s110_s19 = int_to_ptr.vmem [resolvable:$true] %s109_s19 }
   0xe   : > { %s1068_s21 = sadd.s32 1, %s981_s12   ;;  %s26_s22 = sadd.s32 1, %s977_s11 }
   0xf   : > { %s1281_s17 = scalar_select %p1054_p8, 1, 0 }
  0x10   : > { %p797_p9 = pneg %p1054_p8  ;;  %s23_s23 = ssub.s32 %s981_s12, %s1068_s21 }
  0x11   : > { %s870_s24 = scalar_lea.vmem %s110_s19, 512  ;;  %p878_p5 = scmp.lt.s32.totalorder %s110_s19, %s110_s19 }
  0x12   : > { %p1063_p11 = pnand %p797_p9, %p1275_p1  ;;  %p871_p13 = scmp.ne.s32.totalorder %s110_s19, %s870_s24 }
  0x13   : > { %p879_p7 = scmp.lt.s32.totalorder %s870_s24, %s870_s24 }
  0x14   : > { %p861_p12 = pneg %p1063_p11 }
  0x15   : > { %p880_p10 = por %p879_p7, %p878_p5 }
  0x16   : > { %p873_p0 = pnand %p871_p13, %p861_p12 }
  0x18   : > { %p874_p3 = pneg %p873_p0 }
  0x1a   : > { %p881_p2 = pnand %p880_p10, %p874_p3 }
  0x1c   : > { %884 = shalt.err (!%p881_p2)
}
  0x1d   : > { %s984_s25 = smov 128   ;;  %s985_s26 = smov 8  }
  0x1e   : > { %800 = dma.hbm_to_vmem [thread:$0]  (!%p1063_p11), %s1273_s1, 512, %s110_s19, [#allocation7], %s984_s25, %s984_s25, %s985_s26  }
  0x1f   : > { %p24_p9 = scmp.eq.s32.totalorder %s23_s23, 0  ;;  %p33_p12 = scmp.ne.s32.totalorder %s977_s11, %s973_s10 }
  0x20   : > { %p34_p10 = scmp.eq.s32.totalorder %s981_s12, 0  ;;  %p810_p2 = scmp.lt.s32.totalorder %s981_s12, 2 }
  0x21   : > { %s1085_s29 = scalar_select %p24_p9, %s977_s11, %s26_s22  }
  0x22   : > { %p35_p13 = por %p34_p10, %p33_p12  ;;  %p1283_p0 = scmp.eq.s32.totalorder %s1035_s13, 1 }
  0x23   : > { %s123_s3 = sand.u32 1, %s977_s11   ;;  %s749_s4 = sshll.u32 %s981_s12, 9 }
  0x24   : > { %p1089_p3 = por %p1283_p0, %p33_p12  ;;  %s732_s5 = sshll.u32 %s123_s3, 5 }
  0x25   : > { %s1098_s8 = scalar_lea.hbm %s1272_s0, %s749_s4  ;;  %s127_s14 = scalar_lea.vmem [#allocation3], %s732_s5 }
  0x26   : > { %s1284_s30 = scalar_select %p1089_p3, 1, 0 }
  0x27   : > { %s135_s18 = sshll.u32 %s127_s14, 4  ;;  %p1100_p11 = pnand %p810_p2, %p35_p13  ;;  %s136_s18 = int_to_ptr.vmem [resolvable:$true] %s135_s18 }
  0x28   : > { %s124_s20 = scalar_lea.sflag [#allocation4], %s123_s3  ;;  %s885_s22 = scalar_lea.hbm %s1098_s8, 512 }
  0x29   : > { %p886_p5 = scmp.ne.s32.totalorder %s1098_s8, %s885_s22  ;;  %p887_p7 = pneg %p1100_p11 }
  0x2a   : > { %s890_s25 = scalar_lea.hbm %s1272_s0, 1024  ;;  %p891_p10 = scmp.lt.s32.totalorder %s1098_s8, %s1272_s0 }
  0x2b   : > { %p888_p9 = pnand %p887_p7, %p886_p5  ;;  %p892_p2 = scmp.lt.s32.totalorder %s890_s25, %s885_s22 }
  0x2d   : > { %p889_p12 = pneg %p888_p9  ;;  %p893_p13 = por %p892_p2, %p891_p10 }
  0x2f   : > { %p894_p0 = pnand %p893_p13, %p889_p12 }
  0x31   : > { %897 = shalt.err (!%p894_p0)
}
  0x32   : > { %s898_s28 = scalar_lea.vmem %s136_s18, 512  ;;  %s986_s3 = smov [#allocation3]  }
  0x33   : > { %p899_p1 = scmp.ne.s32.totalorder %s136_s18, %s898_s28  ;;  %s903_s4 = sshll.u32 %s986_s3, 4  ;;  %s904_s4 = int_to_ptr.vmem [resolvable:$false] %s903_s4 }
  0x34   : > { %s905_s5 = scalar_lea.vmem %s904_s4, 1024  ;;  %p906_p5 = scmp.lt.s32.totalorder %s136_s18, %s904_s4 }
  0x35   : > { %p901_p6 = pnand %p899_p1, %p887_p7  ;;  %p907_p9 = scmp.lt.s32.totalorder %s905_s5, %s898_s28 }
  0x37   : > { %p902_p3 = pneg %p901_p6  ;;  %p908_p4 = por %p907_p9, %p906_p5 }
  0x39   : > { %p909_p8 = pnand %p908_p4, %p902_p3 }
  0x3b   : > { %912 = shalt.err (!%p909_p8)
}
  0x3c   : > { %804 = dma.hbm_to_vmem [thread:$0]  (!%p1100_p11), %s1098_s8, 512, %s136_s18, %s124_s20  }
  0x3d   : > { %p1286_p12 = scmp.ne.s32.totalorder %s1281_s17, 0 }
  0x3e   : > { %s1121_s6 = sand.u32 (!%p1286_p12), 1, %s973_s10   ;;  %p1287_p1 = scmp.ne.s32.totalorder (!%p1286_p12), %s1279_s15, 0 }
  0x3f   : > { %144 = sbr.rel (%p1286_p12) target bundleno = 470 (0x1d6), region = 28  ;;  %s736_s7 = sshll.u32 (!%p1286_p12), %s1121_s6, 5 }
  0x40   : > { %s147_s14 = scalar_lea.sflag (!%p1286_p12), [#allocation4], %s1121_s6  ;;  %s150_s22 = scalar_lea.vmem (!%p1286_p12), [#allocation3], %s736_s7 }
  0x44   : > { %956 = dma.done.wait (%p1287_p1), %s147_s14, 512  }
  0x45   : > { %958 = vsyncadd (%p1287_p1), %s147_s14, 4294966784  ;;  %p1288_p4 = scmp.eq.s32.totalorder %s1035_s13, 0 }
  0x47   : > { %960 = dma.done.wait (%p1288_p4), [#allocation7], 512   ;;  %p1289_p6 = pmov %p1288_p4 }
  0x48   : > { %v1133_v0 = vld [vmem:[%s150_s22 + $0x8] sm:$0xff]  ;;  %v1135_v1 = vld [vmem:[%s150_s22] sm:$0xff]  ;;  %s987_s17 = smov 90   ;;  %v1139_v2 = vld [vmem:[%s150_s22 + $0x10] sm:$0xff]  ;;  %s988_s15 = smov 91   ;;  %vm420_vm0 = vcmask 588800  }
  0x49   : > { %962 = vsyncadd (%p1289_p6), [#allocation7], 4294966784  ;;  %373 = vrot.lane.b32.xlu0 %v1133_v0, %s987_s17  ;;  %371 = vrot.lane.b32.xlu1 %v1135_v1, %s987_s17  ;;  %s989_s8 = smov 92   ;;  %s990_s18 = smov 108   ;;  %v366_v3 = vld [vmem:[%s150_s22 + $0x18] sm:$0xff]  ;;  %v1159_v4 = vld [vmem:[#allocation6] sm:$0xff] }
  0x4a   : > { %s991_s19 = smov 109   ;;  %s992_s20 = smov 110   ;;  %v994_v5 = vmov 0.0   ;;  %781 = vmatprep.mubr.msk.f32.mxu1 %vm420_vm0, %v1159_v4  ;;  %vm379_vm1 = vcmask 736256   ;;  %vm353_vm2 = vcmask 744448   ;;  %vm327_vm3 = vcmask 752640  }
  0x4b   : > { %s993_s23 = smov 126   ;;  %497 = vmatprep.mubr.f32.mxu0 %v994_v5  ;;  %s995_s24 = smov 127   ;;  %vm301_vm4 = vcmask 883712   ;;  %vm275_vm5 = vcmask 891904   ;;  %vm249_vm6 = vcmask 900096   ;;  %vm223_vm7 = vcmask 1031168  }
  0x4c   : > { %vm197_vm8 = vcmask 1039360   ;;  %v390_v57 = vld [vmem:[#allocation6 + $0x8] sm:$0xff]  ;;  %v391_v62 = vld [vmem:[#allocation6 + $0x10] sm:$0xff]  ;;  %s787_s25 = smul.u32 96, %s1121_s6  ;;  %p1290_p3 = scmp.ne.s32.totalorder %s1284_s30, 0 }
  0x4d   : > { %375 = vrot.lane.b32.xlu0 %v1139_v2, %s987_s17  ;;  %347 = vrot.lane.b32.xlu1 %v1133_v0, %s988_s15  ;;  %s788_s27 = smul.u32 1536, %s1035_s13  ;;  %s632_s13 = scalar_lea.sflag [#allocation5], %s1121_s6 }
  0x4e   : > { %s1208_s26 = scalar_lea.vmem [#allocation8], %s787_s25  ;;  %s996_s14 = smov [#allocation8]  }
  0x4f   : > { %s645_s28 = sshll.u32 %s1208_s26, 4  ;;  %s1225_s5 = scalar_lea.hbm %s1274_s2, %s788_s27  ;;  %s1227_s28 = int_to_ptr.vmem [resolvable:$true] %s645_s28 }
  0x50   : > { %s913_s7 = scalar_lea.vmem %s1227_s28, 1536  ;;  %s917_s22 = sshll.u32 %s996_s14, 4  ;;  %s918_s22 = int_to_ptr.vmem [resolvable:$false] %s917_s22 }
  0x51   : > { %349 = vrot.lane.b32.xlu0 %v1139_v2, %s988_s15  ;;  %345 = vrot.lane.b32.xlu1 %v1135_v1, %s988_s15  ;;  %p914_p8 = scmp.ne.s32.totalorder %s1227_s28, %s913_s7  ;;  %p920_p10 = scmp.lt.s32.totalorder %s1227_s28, %s918_s22 }
  0x53   : > { %p915_p11 = pnand %p914_p8, %p1290_p3 }
  0x55   : > { %323 = vrot.lane.b32.xlu1 %v1139_v2, %s989_s8  ;;  %321 = vrot.lane.b32.xlu0 %v1133_v0, %s989_s8  ;;  %p916_p7 = pneg %p915_p11 }
  0x59   : > { %319 = vrot.lane.b32.xlu0 %v1135_v1, %s989_s8  ;;  %295 = vrot.lane.b32.xlu1 %v1133_v0, %s990_s18 }
  0x5d   : > { %297 = vrot.lane.b32.xlu0 %v1139_v2, %s990_s18  ;;  %293 = vrot.lane.b32.xlu1 %v1135_v1, %s990_s18 }
  0x61   : > { %271 = vrot.lane.b32.xlu1 %v1139_v2, %s991_s19  ;;  %269 = vrot.lane.b32.xlu0 %v1133_v0, %s991_s19 }
  0x65   : > { %377 = vrot.lane.b32.xlu0 %v366_v3, %s987_s17  ;;  %267 = vrot.lane.b32.xlu1 %v1135_v1, %s991_s19  ;;  %s919_s17 = scalar_lea.vmem %s918_s22, 3072 }
  0x66   : > { %p921_p2 = scmp.lt.s32.totalorder %s919_s17, %s913_s7 }
  0x68   : > { %p922_p13 = por %p921_p2, %p920_p10 }
  0x69   : > { %245 = vrot.lane.b32.xlu1 %v1139_v2, %s992_s20  ;;  %243 = vrot.lane.b32.xlu0 %v1133_v0, %s992_s20 }
  0x6a   : > { %p923_p0 = pnand %p922_p13, %p916_p7 }
  0x6d   : > { %351 = vrot.lane.b32.xlu0 %v366_v3, %s988_s15  ;;  %241 = vrot.lane.b32.xlu1 %v1135_v1, %s992_s20 }
  0x71   : > { %219 = vrot.lane.b32.xlu1 %v1139_v2, %s993_s23  ;;  %217 = vrot.lane.b32.xlu0 %v1133_v0, %s993_s23 }
  0x75   : > { %325 = vrot.lane.b32.xlu0 %v366_v3, %s989_s8  ;;  %215 = vrot.lane.b32.xlu1 %v1135_v1, %s993_s23 }
  0x79   : > { %193 = vrot.lane.b32.xlu1 %v1139_v2, %s995_s24  ;;  %191 = vrot.lane.b32.xlu0 %v1133_v0, %s995_s24 }
  0x7d   : > { %299 = vrot.lane.b32.xlu0 %v366_v3, %s990_s18  ;;  %189 = vrot.lane.b32.xlu1 %v1135_v1, %s995_s24 }
  0x81   : > { %273 = vrot.lane.b32.xlu0 %v366_v3, %s991_s19  ;;  %247 = vrot.lane.b32.xlu1 %v366_v3, %s992_s20 }
  0x85   : > { %221 = vrot.lane.b32.xlu0 %v366_v3, %s993_s23  ;;  %195 = vrot.lane.b32.xlu1 %v366_v3, %s995_s24 }
  0xbb   : > { %v374_v6 = vpop.permute.xlu0 %373  ;;  %v372_v7 = vpop.permute.xlu1 %371 }
  0xbc   : > { %v380_v11 = vsel %vm379_vm1, %v372_v7, %v374_v6 }
  0xbf   : > { %v376_v8 = vpop.permute.xlu0 %375  ;;  %v348_v9 = vpop.permute.xlu1 %347 }
  0xc0   : > { %v381_v10 = vsel %vm379_vm1, %v374_v6, %v376_v8 }
  0xc1   : > { %447 = vmatprep.subr.mxu0 %v381_v10 }
  0xc2   : > { %448 = vmatpush1.msra.mxu0 %v380_v11 }
  0xc3   : > { %v350_v12 = vpop.permute.xlu0 %349  ;;  %v346_v13 = vpop.permute.xlu1 %345 }
  0xc4   : > { %v355_v14 = vsel %vm353_vm2, %v348_v9, %v350_v12  ;;  %v354_v15 = vsel %vm353_vm2, %v346_v13, %v348_v9 }
  0xc5   : > { %449 = vmatprep.subr.mxu0 %v355_v14 }
  0xc6   : > { %450 = vmatpush1.msra.mxu0 %v354_v15 }
  0xc7   : > { %v324_v16 = vpop.permute.xlu1 %323  ;;  %v322_v17 = vpop.permute.xlu0 %321 }
  0xc8   : > { %v329_v18 = vsel %vm327_vm3, %v322_v17, %v324_v16 }
  0xc9   : > { %451 = vmatprep.subr.mxu0 %v329_v18 }
  0xcb   : > { %v320_v19 = vpop.permute.xlu0 %319  ;;  %v296_v20 = vpop.permute.xlu1 %295 }
  0xcc   : > { %v328_v21 = vsel %vm327_vm3, %v320_v19, %v322_v17 }
  0xcd   : > { %452 = vmatpush1.msra.mxu0 %v328_v21 }
  0xcf   : > { %v298_v22 = vpop.permute.xlu0 %297  ;;  %v294_v23 = vpop.permute.xlu1 %293 }
  0xd0   : > { %v303_v24 = vsel %vm301_vm4, %v296_v20, %v298_v22  ;;  %v302_v25 = vsel %vm301_vm4, %v294_v23, %v296_v20 }
  0xd1   : > { %453 = vmatprep.subr.mxu0 %v303_v24 }
  0xd2   : > { %454 = vmatpush1.msra.mxu0 %v302_v25 }
  0xd3   : > { %v272_v26 = vpop.permute.xlu1 %271  ;;  %v270_v27 = vpop.permute.xlu0 %269 }
  0xd4   : > { %v277_v28 = vsel %vm275_vm5, %v270_v27, %v272_v26 }
  0xd5   : > { %455 = vmatprep.subr.mxu0 %v277_v28 }
  0xd7   : > { %v378_v29 = vpop.permute.xlu0 %377  ;;  %v268_v30 = vpop.permute.xlu1 %267 }
  0xd8   : > { %v276_v31 = vsel %vm275_vm5, %v268_v30, %v270_v27  ;;  %v382_v32 = vsel %vm379_vm1, %v376_v8, %v378_v29 }
  0xd9   : > { %456 = vmatpush1.msra.mxu0 %v276_v31  ;;  %763 = vmatprep.subr.mxu1 %v382_v32 }
  0xda   : > { %764 = vmatpush3.msra.mxu1 %v382_v32 }
  0xdb   : > { %v246_v33 = vpop.permute.xlu1 %245  ;;  %v244_v34 = vpop.permute.xlu0 %243 }
  0xdc   : > { %v251_v35 = vsel %vm249_vm6, %v244_v34, %v246_v33 }
  0xdd   : > { %457 = vmatprep.subr.mxu0 %v251_v35 }
  0xdf   : > { %v352_v36 = vpop.permute.xlu0 %351  ;;  %v242_v37 = vpop.permute.xlu1 %241 }
  0xe0   : > { %v250_v38 = vsel %vm249_vm6, %v242_v37, %v244_v34  ;;  %v356_v39 = vsel %vm353_vm2, %v350_v12, %v352_v36 }
  0xe1   : > { %458 = vmatpush1.msra.mxu0 %v250_v38  ;;  %765 = vmatprep.subr.mxu1 %v356_v39 }
  0xe2   : > { %766 = vmatpush3.msra.mxu1 %v356_v39 }
  0xe3   : > { %v220_v40 = vpop.permute.xlu1 %219  ;;  %v218_v41 = vpop.permute.xlu0 %217 }
  0xe4   : > { %v225_v42 = vsel %vm223_vm7, %v218_v41, %v220_v40 }
  0xe5   : > { %459 = vmatprep.subr.mxu0 %v225_v42 }
  0xe7   : > { %v326_v43 = vpop.permute.xlu0 %325  ;;  %v216_v44 = vpop.permute.xlu1 %215 }
  0xe8   : > { %v224_v45 = vsel %vm223_vm7, %v216_v44, %v218_v41  ;;  %v330_v46 = vsel %vm327_vm3, %v324_v16, %v326_v43 }
  0xe9   : > { %460 = vmatpush1.msra.mxu0 %v224_v45  ;;  %767 = vmatprep.subr.mxu1 %v330_v46 }
  0xea   : > { %768 = vmatpush3.msra.mxu1 %v330_v46 }
  0xeb   : > { %v194_v47 = vpop.permute.xlu1 %193  ;;  %v192_v48 = vpop.permute.xlu0 %191 }
  0xec   : > { %v199_v49 = vsel %vm197_vm8, %v192_v48, %v194_v47 }
  0xed   : > { %461 = vmatprep.subr.mxu0 %v199_v49 }
  0xef   : > { %v300_v50 = vpop.permute.xlu0 %299  ;;  %v190_v51 = vpop.permute.xlu1 %189 }
  0xf0   : > { %v198_v52 = vsel %vm197_vm8, %v190_v51, %v192_v48  ;;  %v304_v53 = vsel %vm301_vm4, %v298_v22, %v300_v50 }
  0xf1   : > { %462 = vmatpush1.msra.mxu0 %v198_v52  ;;  %769 = vmatprep.subr.mxu1 %v304_v53 }
  0xf2   : > { %770 = vmatpush3.msra.mxu1 %v304_v53  ;;  %463 = vmatprep.subr.mxu0 %v1133_v0  ;;  %v392_v0 = vld [vmem:[#allocation6 + $0x18] sm:$0xff] }
  0xf3   : > { %v274_v54 = vpop.permute.xlu0 %273  ;;  %v248_v55 = vpop.permute.xlu1 %247  ;;  %464 = vmatpush1.msra.mxu0 %v1135_v1 }
  0xf4   : > { %738 = vmatmul.mubr.msk.f32.vlgmr.msra.gmra.mxu0 %vm420_vm0, %v1159_v4  ;;  %v278_v56 = vsel %vm275_vm5, %v272_v26, %v274_v54  ;;  %v252_v58 = vsel %vm249_vm6, %v246_v33, %v248_v55 }
  0xf5   : > { %771 = vmatprep.subr.mxu1 %v278_v56  ;;  %503 = vmatprep.mubr.f32.mxu0 %v994_v5 }
  0xf6   : > { %772 = vmatpush3.msra.mxu1 %v278_v56 }
  0xf7   : > { %v222_v59 = vpop.permute.xlu0 %221  ;;  %773 = vmatprep.subr.mxu1 %v252_v58  ;;  %v196_v60 = vpop.permute.xlu1 %195 }
  0xf8   : > { %774 = vmatpush3.msra.mxu1 %v252_v58  ;;  %739 = vmatmul.mubr.msk.f32.gmra.mxu0 %vm420_vm0, %v390_v57  ;;  %v226_v61 = vsel %vm223_vm7, %v220_v40, %v222_v59  ;;  %v200_v63 = vsel %vm197_vm8, %v194_v47, %v196_v60 }
  0xf9   : > { %775 = vmatprep.subr.mxu1 %v226_v61  ;;  %509 = vmatprep.mubr.f32.mxu0 %v994_v5 }
  0xfa   : > { %776 = vmatpush3.msra.mxu1 %v226_v61 }
  0xfb   : > { %777 = vmatprep.subr.mxu1 %v200_v63 }
  0xfc   : > { %778 = vmatpush3.msra.mxu1 %v200_v63  ;;  %740 = vmatmul.mubr.msk.f32.gmra.mxu0 %vm420_vm0, %v391_v62 }
  0xfd   : > { %779 = vmatprep.subr.mxu1 %v1139_v2  ;;  %515 = vmatprep.mubr.f32.mxu0 %v994_v5 }
  0xfe   : > { %780 = vmatpush3.msra.mxu1 %v1139_v2 }
  0xff   : > { %782 = vmatmul.mubr.msk.f32.vlgmr.msra.gmra.mxu1 %vm420_vm0, %v390_v57 }
 0x100   : > { %741 = vmatmul.mubr.msk.f32.gmra.mxu0 %vm420_vm0, %v392_v0  ;;  %784 = vmatprep.mubr.msk.f32.mxu1 %vm420_vm0, %v391_v62 }
 0x103   : > { %785 = vmatmul.mubr.msk.f32.gmra.mxu1 %vm420_vm0, %v392_v0 }
 0x1b4   : > { %v499_v1 = vpop.f32.mrf.mxu0 }
 0x1b5   : > { %v607_v3 = vmax.f32 %v499_v1, 0.0 }
 0x1b6   : > { %v501_v4 = vpop.f32.mrf.mxu0 }
 0x1b7   : > { %619 = vst [vmem:[%s1208_s26] sm:$0xff] %v607_v3  ;;  %v608_v2 = vmax.f32 %v501_v4, 0.0 }
 0x1b8   : > { %v505_v5 = vpop.f32.mrf.mxu0 }
 0x1b9   : > { %620 = vst [vmem:[%s1208_s26 + $0x8] sm:$0xff] %v608_v2  ;;  %v610_v6 = vmax.f32 %v505_v5, 0.0 }
 0x1ba   : > { %v507_v7 = vpop.f32.mrf.mxu0 }
 0x1bb   : > { %622 = vst [vmem:[%s1208_s26 + $0x18] sm:$0xff] %v610_v6  ;;  %v611_v8 = vmax.f32 %v507_v7, 0.0 }
 0x1bc   : > { %v511_v9 = vpop.f32.mrf.mxu0 }
 0x1bd   : > { %623 = vst [vmem:[%s1208_s26 + $0x20] sm:$0xff] %v611_v8  ;;  %v613_v10 = vmax.f32 %v511_v9, 0.0 }
 0x1be   : > { %v513_v11 = vpop.f32.mrf.mxu0 }
 0x1bf   : > { %625 = vst [vmem:[%s1208_s26 + $0x30] sm:$0xff] %v613_v10  ;;  %v614_v12 = vmax.f32 %v513_v11, 0.0  ;;  %v783_v13 = vpop.f32.mrf.mxu1 }
 0x1c0   : > { %v612_v14 = vmax.f32 %v783_v13, 0.0  ;;  %v517_v15 = vpop.f32.mrf.mxu0 }
 0x1c1   : > { %626 = vst [vmem:[%s1208_s26 + $0x38] sm:$0xff] %v614_v12  ;;  %v616_v16 = vmax.f32 %v517_v15, 0.0  ;;  %v588_v17 = vpop.f32.mrf.mxu1 }
 0x1c2   : > { %624 = vst [vmem:[%s1208_s26 + $0x28] sm:$0xff] %v612_v14  ;;  %v609_v18 = vmax.f32 %v588_v17, 0.0  ;;  %v519_v19 = vpop.f32.mrf.mxu0 }
 0x1c3   : > { %628 = vst [vmem:[%s1208_s26 + $0x48] sm:$0xff] %v616_v16  ;;  %v617_v20 = vmax.f32 %v519_v19, 0.0  ;;  %v786_v21 = vpop.f32.mrf.mxu1 }
 0x1c4   : > { %621 = vst [vmem:[%s1208_s26 + $0x10] sm:$0xff] %v609_v18  ;;  %v618_v22 = vmax.f32 %v786_v21, 0.0 }
 0x1c5   : > { %629 = vst [vmem:[%s1208_s26 + $0x50] sm:$0xff] %v617_v20  ;;  %v598_v23 = vpop.f32.mrf.mxu1 }
 0x1c6   : > { %630 = vst [vmem:[%s1208_s26 + $0x58] sm:$0xff] %v618_v22  ;;  %v615_v24 = vmax.f32 %v598_v23, 0.0 }
 0x1c8   : > { %627 = vst [vmem:[%s1208_s26 + $0x40] sm:$0xff] %v615_v24 }
 0x1c9   : > { %926 = shalt.err (!%p923_p0)
}
 0x1ca   : > { %s927_s15 = scalar_lea.hbm %s1225_s5, 1536  ;;  %s931_s19 = scalar_lea.hbm %s1274_s2, 3072 }
 0x1cb   : > { %p928_p5 = scmp.ne.s32.totalorder %s1225_s5, %s927_s15  ;;  %p932_p1 = scmp.lt.s32.totalorder %s1225_s5, %s1274_s2 }
 0x1cc   : > { %p933_p4 = scmp.lt.s32.totalorder %s931_s19, %s927_s15 }
 0x1cd   : > { %p929_p9 = pnand %p928_p5, %p1290_p3 }
 0x1ce   : > { %p934_p6 = por %p933_p4, %p932_p1 }
 0x1cf   : > { %p930_p12 = pneg %p929_p9 }
 0x1d1   : > { %p935_p8 = pnand %p934_p6, %p930_p12 }
 0x1d3   : > { %938 = shalt.err (!%p935_p8)
}
 0x1d4   : > { %s997_s24 = smov 384   ;;  %s998_s25 = smov 24  }
 0x1d5   : > { %795 = dma.vmem_to_hbm [thread:$0]  (%p1290_p3), %s1227_s28, 1536, %s1225_s5, %s632_s13, %s997_s24, %s997_s24, %s998_s25  }
 0x1d6 PF: > { %s660_s26 = sand.u32 1, %s969_s9   ;;  %p1291_p11 = scmp.ne.s32.totalorder %s1280_s16, 0 }
 0x1d7   : > { %p1292_p7 = scmp.ge.s32.totalorder %s981_s12, 2  ;;  %s661_s27 = scalar_lea.sflag [#allocation5], %s660_s26 }
 0x1d9   : > { %p806_p10 = pnand %p1292_p7, %p1291_p11 }
 0x1db   : > { %p807_p2 = pneg %p806_p10 }
 0x1dd   : > { %964 = dma.done.wait (%p807_p2), %s661_s27, 1536  }
 0x1de   : > { %966 = vsyncadd (%p807_p2), %s661_s27, 4294965760  ;;  %p16_p13 = scmp.ge.s32.totalorder %s1068_s21, 4   ;;  %s1293_s9 = smov %s973_s10 }
 0x1df   : > { %s1294_s10 = smov %s977_s11  ;;  %s1295_s11 = smov %s1085_s29 }
 0x1e0   : > { %s1296_s12 = smov %s1068_s21  ;;  %18 = sbr.rel (!%p16_p13) target bundleno = 6 (0x6), region = 77 }
 0x1e5   :  { %666 = vsyncpa [#allocation4], 1 }
 0x1e6   :  { %668 = vsyncpa [#allocation4 + $0x1], 1 }
 0x1e7   :  { %669 = vsyncpa [#allocation7], 1 }
 0x1e8   :  { %670 = vsyncpa [#allocation5], 1 }
 0x1e9   :  { %672 = vsyncpa [#allocation5 + $0x1], 1 }

</bundles_post_ra>
